<compile_context>
chip_gen: v6e
topology: v6e:2x2x1
jax: 0.10.0
libtpu: 0.0.40
codegen_flags: <defaults>
</compile_context>

<pallas_src>
import functools

import jax
import jax.numpy as jnp
from jax.experimental import pallas as pl
from jax.experimental.pallas import tpu as pltpu


def _probe_score_kernel(acts_ref, w_ref, b_ref, plen_ref, out_ref, sum_acc, *,
                        seq_len, seq_tile, h_chunk):
    """Grid = (batch-block [parallel], layer [parallel], seq-tile [arbitrary/reduction]).

    acts_ref : (bt, ts, H)  activations, native dtype (bf16 in the demo)
    w_ref    : (1, H)       probe weight for this layer, f32
    b_ref    : (1, 1)       probe bias for this layer, f32
    plen_ref : (bt, 1)      prompt lengths, int32
    out_ref  : (bt, 1)      per-layer masked mean of sigmoid scores
    sum_acc  : (bt, 1)      VMEM scratch: masked score sum across seq tiles
    """
    s = pl.program_id(2)
    n_s = pl.num_programs(2)

    @pl.when(s == 0)
    def _():
        sum_acc[...] = jnp.zeros_like(sum_acc)

    bt, ts, hidden = acts_ref.shape

    # --- LinearProbe.predict on this tile: sigmoid(<x, w> + b) ---------------------------
    # Chunked over H: each chunk is loaded from the (native-dtype) VMEM block and upcast to
    # f32 only for that chunk, so no full (bt, ts, H) f32 temporary ever exists.
    acc = jnp.zeros((bt, ts), jnp.float32)
    for c0 in range(0, hidden, h_chunk):
        c1 = min(hidden, c0 + h_chunk)
        xc = acts_ref[:, :, c0:c1].astype(jnp.float32)          # (bt, ts, c), bounded f32
        wc = w_ref[:, c0:c1].reshape(1, 1, c1 - c0)             # (1, 1, c) f32
        acc = acc + jnp.sum(xc * wc, axis=-1)                   # VPU mul + lane reduce
    logits = acc + b_ref[...]                                   # (1,1) bias broadcast
    scores = jax.nn.sigmoid(logits)                             # (bt, ts) f32

    # --- aggregate_preds(method='mean'): masked partial sum over generated tokens --------
    plen = plen_ref[...]                                        # (bt, 1) int32
    pos = s * seq_tile + jax.lax.broadcasted_iota(jnp.int32, scores.shape, 1)
    mask = jnp.logical_and(pos >= plen, pos < seq_len)          # pos<seq_len masks ragged tile
    sum_acc[...] += jnp.sum(jnp.where(mask, scores, 0.0), axis=1, keepdims=True)

    # --- end of the sequence reduction: masked mean (nanmean equivalent) -----------------
    @pl.when(s == n_s - 1)
    def _():
        cnt = jnp.maximum(jnp.float32(seq_len) - plen.astype(jnp.float32), 1.0)
        out_ref[...] = (sum_acc[...] / cnt).astype(out_ref.dtype)


def _vmem_capacity_bytes():
    """Per-TensorCore VMEM capacity; conservative 64 MiB (v7x) fallback if unavailable."""
    try:
        info = pltpu.get_tpu_info()
        cap = getattr(info, "vmem_capacity_bytes", None)
        if cap:
            return int(cap)
    except Exception:
        pass
    return 64 * 2**20


def _pick_seq_tile(seq_len, max_ts):
    """Largest S-tile under the budget. Multiple of 8 (sublane) unless it covers all of S.
    Prefers a large ragged last tile over a small exact divisor (<256 rows)."""
    if seq_len <= max_ts:
        return seq_len
    max_ts = max(8, (max_ts // 8) * 8)
    for ts in range(max_ts, 255, -8):      # exact divisor only if it stays >= 256 rows
        if seq_len % ts == 0:
            return ts
    return max_ts                           # ragged last tile; kernel masks pos < seq_len


def reward_model_forward(activations, probe_w, probe_b, prompt_lengths, labels,
                         prompt_has_trigger, *, negative_is_1=True,
                         probe_threshold=0.5, reward_fn_name="continuous",
                         batch_tile=None, seq_tile=None, vmem_target_bytes=None):
    """activations: [L, B, S, H] (any float dtype, streamed in native dtype); probe_w: [L, H];
    probe_b: [L]; prompt_lengths: [B] int; labels / prompt_has_trigger: [B] in {0, 1}.
    Returns the layer-averaged reward, shape [B] (float32)."""
    L, B, S, H = activations.shape
    itemsize = jnp.dtype(activations.dtype).itemsize

    # --- batch tiling: guarantee >=2 parallel programs where the (8,·) rule allows it ----
    if batch_tile is None:
        batch_tile = B
        if B >= 16 and (B // 2) % 8 == 0:
            batch_tile = B // 2
    assert B % batch_tile == 0, "batch_tile must divide B"
    assert batch_tile == B or batch_tile % 8 == 0, "batch_tile must be B or a multiple of 8"

    h_chunk = H if H <= 512 else 512        # bound on the in-kernel f32 chunk width

    # --- VMEM budgeting (accounts for native double-buffered blocks + f32 chunk temps) ---
    vmem_cap = _vmem_capacity_bytes()
    if vmem_target_bytes is None:
        vmem_target_bytes = min(vmem_cap - (12 << 20), 112 << 20)
    vmem_target_bytes = max(int(vmem_target_bytes), 16 << 20)

    if seq_tile is None:
        fixed = 4 << 20                                         # weights/bias/plen/out/scratch/slack
        per_row = batch_tile * (2 * H * itemsize + 8 * h_chunk) # 2x native DMA bufs + ~2 f32 temps
        max_ts = max(8, (vmem_target_bytes - fixed) // per_row)
        seq_tile = _pick_seq_tile(S, max_ts)
    assert seq_tile == S or seq_tile % 8 == 0, "seq_tile must be S or a multiple of 8"

    nb = B // batch_tile
    ns = pl.cdiv(S, seq_tile)

    est_bytes = (2 * batch_tile * seq_tile * H * itemsize       # double-buffered act blocks
                 + 8 * batch_tile * seq_tile * h_chunk          # in-kernel f32 chunk temporaries
                 + (2 << 20))                                   # small residents
    vmem_limit = int(min(vmem_cap, max(32 << 20, est_bytes + (8 << 20))))

    plen_col = jnp.clip(prompt_lengths.astype(jnp.int32), 0, S).reshape(B, 1)
    probe_w3 = probe_w.astype(jnp.float32).reshape(L, 1, H)
    probe_b3 = probe_b.astype(jnp.float32).reshape(L, 1, 1)

    kernel = functools.partial(_probe_score_kernel,
                               seq_len=S, seq_tile=seq_tile, h_chunk=h_chunk)

    agg = pl.pallas_call(
        kernel,
        out_shape=jax.ShapeDtypeStruct((L, B, 1), jnp.float32),
        grid_spec=pltpu.PrefetchScalarGridSpec(
            num_scalar_prefetch=0,
            grid=(nb, L, ns),
            in_specs=[
                # activations: native dtype, squeezed layer dim, tiled (bt, ts, H)
                pl.BlockSpec((None, batch_tile, seq_tile, H), lambda b, l, s: (l, b, s, 0)),
                pl.BlockSpec((None, 1, H), lambda b, l, s: (l, 0, 0)),   # probe weight / layer
                pl.BlockSpec((None, 1, 1), lambda b, l, s: (l, 0, 0)),   # probe bias / layer
                pl.BlockSpec((batch_tile, 1), lambda b, l, s: (b, 0)),   # prompt_lengths
            ],
            out_specs=pl.BlockSpec((None, batch_tile, 1), lambda b, l, s: (l, b, 0)),
            scratch_shapes=[pltpu.VMEM((batch_tile, 1), jnp.float32)],   # masked score sum
        ),
        compiler_params=pltpu.CompilerParams(
            dimension_semantics=("parallel", "parallel", "arbitrary"),
            vmem_limit_bytes=vmem_limit,
        ),
    )(activations, probe_w3, probe_b3, plen_col)

    # --- trivial O(L*B) reward epilogue in the wrapper (per review) -----------------------
    # TODO(synk): reward_map ('threshold'/'gaussian') is not defined in the source module;
    # only the default 'continuous' reward is implemented here.
    agg = agg[:, :, 0]                                           # (L, B) masked means
    labels_f = jnp.asarray(labels, jnp.float32).reshape(B)
    trig_f = jnp.asarray(prompt_has_trigger, jnp.float32).reshape(B)
    target = labels_f if negative_is_1 else 1.0 - labels_f
    aligned = jnp.where(target[None, :] > probe_threshold, agg, 1.0 - agg)
    reward = (2.0 * aligned - 1.0) * (1.0 - 2.0 * trig_f[None, :])  # sign flip if trigger
    return reward.mean(axis=0)                                   # mean over probe layers -> [B]


def _reference(activations, probe_w, probe_b, prompt_lengths, labels, trig,
               negative_is_1=True, probe_threshold=0.5):
    acts = activations.astype(jnp.float32)
    L, B, S, H = acts.shape
    logits = (jnp.sum(acts * probe_w.astype(jnp.float32)[:, None, None, :], axis=-1)
              + probe_b.astype(jnp.float32)[:, None, None])
    scores = jax.nn.sigmoid(logits)                              # (L, B, S)
    pos = jnp.arange(S)[None, :]
    mask = pos >= prompt_lengths[:, None]                        # (B, S)
    agg = (jnp.sum(jnp.where(mask[None], scores, 0.0), -1)
           / jnp.maximum(jnp.sum(mask, -1)[None], 1))            # (L, B) nanmean equiv.
    target = labels if negative_is_1 else 1.0 - labels
    aligned = jnp.where(target[None] > probe_threshold, agg, 1.0 - agg)
    reward = (2.0 * aligned - 1.0) * (1.0 - 2.0 * trig[None])
    return reward.mean(0)


if __name__ == "__main__":
    # TODO(synk): the SparseAutoencoder / LM activation caching (cache_activations) is an
    # external transformer forward; activations are synthesized directly here.
    key = jax.random.PRNGKey(0)
    L, B, S, H = 2, 2, 32, 32  # probe layers, batch, seq, hidden (small demo shapes)

    k_acts, k_w, k_b = jax.random.split(key, 3)
    activations = jax.random.normal(k_acts, (L, B, S, H), dtype=jnp.float32).astype(jnp.bfloat16)
    probe_w = jax.random.normal(k_w, (L, H), dtype=jnp.float32) * 0.1
    probe_b = jax.random.normal(k_b, (L,), dtype=jnp.float32) * 0.1

    prompt_lengths = jnp.array([3, 20], dtype=jnp.int32)
    labels = jnp.array([1.0, 0.0], dtype=jnp.float32)               # batch['label']
    prompt_has_trigger = jnp.array([0.0, 1.0], dtype=jnp.float32)   # batch['is_backdoored']

    # seq_tile=8 forces the multi-tile (S-tiled) accumulation path even at demo size.
    rewards = reward_model_forward(
        activations, probe_w, probe_b, prompt_lengths, labels, prompt_has_trigger,
        seq_tile=8)
    rewards = jax.block_until_ready(rewards)

    ref = _reference(activations, probe_w, probe_b, prompt_lengths, labels,
                     prompt_has_trigger)
    assert rewards.shape == (B,)
    assert jnp.allclose(rewards, ref, atol=2e-5, rtol=2e-5), (rewards, ref)
    print("KERNEL_OK")
</pallas_src>

<mosaic_0001>
module attributes {stable_mosaic.version = 11 : i64} {
  func.func @_probe_score_kernel(%arg0: i32, %arg1: i32, %arg2: i32, %arg3: memref<1x2x8x32xbf16, #tpu.memory_space<vmem>>, %arg4: memref<1x1x32xf32, #tpu.memory_space<vmem>>, %arg5: memref<1x1x1xf32, #tpu.memory_space<vmem>>, %arg6: memref<2x1xi32, #tpu.memory_space<vmem>>, %arg7: memref<1x2x1xf32, #tpu.memory_space<vmem>>, %arg8: memref<2x1xf32, #tpu.memory_space<vmem>>) attributes {dimension_semantics = [#tpu.dimension_semantics<parallel>, #tpu.dimension_semantics<parallel>, #tpu.dimension_semantics<arbitrary>], iteration_bounds = array<i64: 1, 2, 4>, scalar_prefetch = 0 : i64, scratch_operands = 1 : i64, tpu.core_type = #tpu.core_type<tc>, window_params = [{transform_indices = @transform_0, window_bounds = array<i64: 1, 2, 8, 32>}, {transform_indices = @transform_1, window_bounds = array<i64: 1, 1, 32>}, {transform_indices = @transform_2, window_bounds = array<i64: 1, 1, 1>}, {transform_indices = @transform_3, window_bounds = array<i64: 2, 1>}, {transform_indices = @transform_4, window_bounds = array<i64: 1, 2, 1>}]} {
    %c0_i32 = arith.constant 0 : i32
    %0 = arith.cmpi eq, %arg2, %c0_i32 : i32
    %1 = arith.extui %0 : i1 to i32
    %c0_i32_0 = arith.constant 0 : i32
    %2 = arith.cmpi ne, %1, %c0_i32_0 : i32
    scf.if %2 {
      %cst_21 = arith.constant 0.000000e+00 : f32
      %43 = vector.broadcast %cst_21 : f32 to vector<2x1xf32>
      %c0_22 = arith.constant 0 : index
      %c0_23 = arith.constant 0 : index
      %44 = vector.load %arg8[%c0_22, %c0_23] : memref<2x1xf32, #tpu.memory_space<vmem>>, vector<2x1xf32>
      tpu.vector_store %arg8[%c0_22, %c0_23], %43 {strides = array<i32>} : memref<2x1xf32, #tpu.memory_space<vmem>>, vector<2x1xf32>,
    } else {
    }
    %cst = arith.constant 0.000000e+00 : f32
    %3 = vector.broadcast %cst : f32 to vector<2x8xf32>
    %c0 = arith.constant 0 : index
    %c0_1 = arith.constant 0 : index
    %c0_2 = arith.constant 0 : index
    %c0_3 = arith.constant 0 : index
    %4 = vector.load %arg3[%c0, %c0_1, %c0_2, %c0_3] : memref<1x2x8x32xbf16, #tpu.memory_space<vmem>>, vector<1x2x8x32xbf16>
    %5 = vector.shape_cast %4 : vector<1x2x8x32xbf16> to vector<2x8x32xbf16>
    %6 = arith.extf %5 : vector<2x8x32xbf16> to vector<2x8x32xf32>
    %c0_4 = arith.constant 0 : index
    %c0_5 = arith.constant 0 : index
    %c0_6 = arith.constant 0 : index
    %7 = vector.load %arg4[%c0_4, %c0_5, %c0_6] : memref<1x1x32xf32, #tpu.memory_space<vmem>>, vector<1x1x32xf32>
    %8 = vector.shape_cast %7 : vector<1x1x32xf32> to vector<1x32xf32>
    %9 = vector.shape_cast %8 : vector<1x32xf32> to vector<1x1x32xf32>
    %10 = vector.broadcast %9 : vector<1x1x32xf32> to vector<2x8x32xf32>
    %11 = arith.mulf %6, %10 : vector<2x8x32xf32>
    %cst_7 = arith.constant dense<0.000000e+00> : vector<2x8xf32>
    %12 = vector.multi_reduction <add>, %11, %cst_7 [2] : vector<2x8x32xf32> to vector<2x8xf32>
    %13 = arith.addf %3, %12 : vector<2x8xf32>
    %c0_8 = arith.constant 0 : index
    %c0_9 = arith.constant 0 : index
    %c0_10 = arith.constant 0 : index
    %14 = vector.load %arg5[%c0_8, %c0_9, %c0_10] : memref<1x1x1xf32, #tpu.memory_space<vmem>>, vector<1x1x1xf32>
    %15 = vector.shape_cast %14 : vector<1x1x1xf32> to vector<1x1xf32>
    %16 = vector.broadcast %15 : vector<1x1xf32> to vector<2x8xf32>
    %17 = arith.addf %13, %16 : vector<2x8xf32>
    %18 = arith.negf %17 : vector<2x8xf32>
    %19 = math.exp %18 : vector<2x8xf32>
    %cst_11 = arith.constant 1.000000e+00 : f32
    %20 = vector.broadcast %cst_11 : f32 to vector<2x8xf32>
    %21 = arith.addf %20, %19 : vector<2x8xf32>
    %22 = arith.divf %20, %21 : vector<2x8xf32>
    %c0_12 = arith.constant 0 : index
    %c0_13 = arith.constant 0 : index
    %23 = vector.load %arg6[%c0_12, %c0_13] : memref<2x1xi32, #tpu.memory_space<vmem>>, vector<2x1xi32>
    %c8_i32 = arith.constant 8 : i32
    %24 = arith.muli %arg2, %c8_i32 : i32
    %25 = tpu.iota {dimensions = array<i32: 1>} : vector<2x8xi32>
    %26 = vector.broadcast %24 : i32 to vector<2x8xi32>
    %27 = arith.addi %26, %25 : vector<2x8xi32>
    %28 = vector.broadcast %23 : vector<2x1xi32> to vector<2x8xi32>
    %29 = arith.cmpi sge, %27, %28 : vector<2x8xi32>
    %c32_i32 = arith.constant 32 : i32
    %30 = vector.broadcast %c32_i32 : i32 to vector<2x8xi32>
    %31 = arith.cmpi slt, %27, %30 : vector<2x8xi32>
    %32 = arith.andi %29, %31 : vector<2x8xi1>
    %c0_14 = arith.constant 0 : index
    %c0_15 = arith.constant 0 : index
    %33 = vector.load %arg8[%c0_14, %c0_15] : memref<2x1xf32, #tpu.memory_space<vmem>>, vector<2x1xf32>
    %cst_16 = arith.constant 0.000000e+00 : f32
    %34 = vector.broadcast %cst_16 : f32 to vector<2x8xf32>
    %35 = arith.select %32, %22, %34 : vector<2x8xi1>, vector<2x8xf32>
    %cst_17 = arith.constant dense<0.000000e+00> : vector<2xf32>
    %36 = vector.multi_reduction <add>, %35, %cst_17 [1] : vector<2x8xf32> to vector<2xf32>
    %37 = vector.shape_cast %36 : vector<2xf32> to vector<2x1xf32>
    %38 = arith.addf %33, %37 : vector<2x1xf32>
    %c0_18 = arith.constant 0 : index
    %c0_19 = arith.constant 0 : index
    %39 = vector.load %arg8[%c0_18, %c0_19] : memref<2x1xf32, #tpu.memory_space<vmem>>, vector<2x1xf32>
    tpu.vector_store %arg8[%c0_18, %c0_19], %38 {strides = array<i32>} : memref<2x1xf32, #tpu.memory_space<vmem>>, vector<2x1xf32>,
    %c3_i32 = arith.constant 3 : i32
    %40 = arith.cmpi eq, %arg2, %c3_i32 : i32
    %41 = arith.extui %40 : i1 to i32
    %c0_i32_20 = arith.constant 0 : i32
    %42 = arith.cmpi ne, %41, %c0_i32_20 : i32
    scf.if %42 {
      %43 = arith.sitofp %23 : vector<2x1xi32> to vector<2x1xf32>
      %cst_21 = arith.constant 3.200000e+01 : f32
      %44 = vector.broadcast %cst_21 : f32 to vector<2x1xf32>
      %45 = arith.subf %44, %43 : vector<2x1xf32>
      %cst_22 = arith.constant 1.000000e+00 : f32
      %46 = vector.broadcast %cst_22 : f32 to vector<2x1xf32>
      %47 = arith.maximumf %45, %46 : vector<2x1xf32>
      %c0_23 = arith.constant 0 : index
      %c0_24 = arith.constant 0 : index
      %48 = vector.load %arg8[%c0_23, %c0_24] : memref<2x1xf32, #tpu.memory_space<vmem>>, vector<2x1xf32>
      %49 = arith.divf %48, %47 : vector<2x1xf32>
      %c0_25 = arith.constant 0 : index
      %c0_26 = arith.constant 0 : index
      %c0_27 = arith.constant 0 : index
      %50 = vector.load %arg7[%c0_25, %c0_26, %c0_27] : memref<1x2x1xf32, #tpu.memory_space<vmem>>, vector<1x2x1xf32>
      %51 = vector.shape_cast %50 : vector<1x2x1xf32> to vector<2x1xf32>
      %52 = vector.shape_cast %49 : vector<2x1xf32> to vector<1x2x1xf32>
      tpu.vector_store %arg7[%c0_25, %c0_26, %c0_27], %52 {strides = array<i32>} : memref<1x2x1xf32, #tpu.memory_space<vmem>>, vector<1x2x1xf32>,
    } else {
    }
    return
  }
  func.func @transform_0(%arg0: i32, %arg1: i32, %arg2: i32) -> (i32, i32, i32, i32) {
    %c0_i32 = arith.constant 0 : i32
    %c0_i32_0 = arith.constant 0 : i32
    return %arg1, %arg0, %arg2, %c0_i32 : i32, i32, i32, i32
  }
  func.func @transform_1(%arg0: i32, %arg1: i32, %arg2: i32) -> (i32, i32, i32) {
    %c0_i32 = arith.constant 0 : i32
    %c0_i32_0 = arith.constant 0 : i32
    %c0_i32_1 = arith.constant 0 : i32
    return %arg1, %c0_i32, %c0_i32_0 : i32, i32, i32
  }
  func.func @transform_2(%arg0: i32, %arg1: i32, %arg2: i32) -> (i32, i32, i32) {
    %c0_i32 = arith.constant 0 : i32
    %c0_i32_0 = arith.constant 0 : i32
    %c0_i32_1 = arith.constant 0 : i32
    return %arg1, %c0_i32, %c0_i32_0 : i32, i32, i32
  }
  func.func @transform_3(%arg0: i32, %arg1: i32, %arg2: i32) -> (i32, i32) {
    %c0_i32 = arith.constant 0 : i32
    %c0_i32_0 = arith.constant 0 : i32
    return %arg0, %c0_i32 : i32, i32
  }
  func.func @transform_4(%arg0: i32, %arg1: i32, %arg2: i32) -> (i32, i32, i32) {
    %c0_i32 = arith.constant 0 : i32
    %c0_i32_0 = arith.constant 0 : i32
    return %arg1, %arg0, %c0_i32 : i32, i32, i32
  }
}

</mosaic_0001>

<bundles_post_ra>
// kernel: tpu_custom_call.1
= control target key start
LH: loop header
LB: loop body
LE: loop exit
PB: predicated region body
PF: predicated region fallthrough
CT: control target
= control target key end

     0   :  { %9 = vsyncpa [#allocation4], 0  ;;  %s897_s0 = inlined_call_operand.hbm [shape: bf16[2,2,32,32], index: 0, kind: input, shape index: {}]   ;;  %s898_s1 = inlined_call_operand.vmem [shape: f32[2,1,32], index: 1, kind: input, shape index: {}]   ;;  %s899_s2 = inlined_call_operand.vmem [shape: f32[2,1,1], index: 2, kind: input, shape index: {}]   ;;  %s900_s3 = inlined_call_operand.vmem [shape: s32[2,1], index: 3, kind: input, shape index: {}]   ;;  %s901_s4 = inlined_call_operand.vmem [shape: f32[2,2,1], index: 4, kind: output, shape index: {}]  }
   0x1   :  { %11 = vsyncpa [#allocation4 + $0x1], 0  ;;  %s759_s15 = smov 0   ;;  %s761_s16 = smov 0  }
   0x2   :  { %s763_s17 = smov 0   ;;  %s765_s18 = smov 0  }
   0x3   :  { %s767_s19 = smov 0   ;;  %s769_s20 = smov 0  }
   0x4   :  { %s771_s21 = smov 0   ;;  %s773_s22 = smov 0  }
   0x5 LB: > { %s520_s23 = sadd.s32 4294967295, %s726_s22   ;;  %s29_s24 = sadd.s32 1, %s718_s20  ;;  %s726_s22 = sphi %s773_s22, %s17_s22   ;;  %s722_s21 = sphi %s771_s21, %s914_s21   ;;  %s718_s20 = sphi %s769_s20, %s913_s20   ;;  %s714_s19 = sphi %s767_s19, %s912_s19   ;;  %s710_s18 = sphi %s765_s18, %s911_s18   ;;  %s706_s17 = sphi %s763_s17, %s910_s17   ;;  %s702_s16 = sphi %s761_s16, %s909_s16   ;;  %s698_s15 = sphi %s759_s15, %s908_s15  }
   0x6   : > { %p30_p0 = scmp.ge.s32.totalorder %s29_s24, 4  ;;  %s32_s25 = sadd.s32 1, %s722_s21 }
   0x7   : > { %s47_s26 = sadd.s32 1, %s706_s17  ;;  %p54_p1 = scmp.ne.s32.totalorder %s706_s17, %s702_s16 }
   0x8   : > { %s916_s24 = smov (%p30_p0, %s29_s24), 0  ;;  %s918_s25 = smov (!%p30_p0, %s32_s25), %s722_s21 }
   0x9   : > { %s43_s27 = ssub.s32 %s718_s20, %s916_s24  ;;  %p55_p2 = scmp.eq.s32.totalorder %s726_s22, 0 }
   0xa   : > { %p34_p3 = scmp.ge.s32.totalorder %s918_s25, 2  ;;  %p60_p4 = scmp.ne.s32.totalorder %s702_s16, %s698_s15 }
   0xb   : > { %p810_p5 = por %p55_p2, %p54_p1  ;;  %p61_p6 = scmp.eq.s32.totalorder %s520_s23, 0 }
   0xc   : > { %s920_s25 = smov (%p34_p3, %s918_s25), 0  ;;  %p550_p8 = scmp.lt.s32.totalorder %s726_s22, 8 }
   0xd   : > { %904 = sst [smem:[#allocation6_spill]] %s920_s25  ;;  %p816_p7 = por %p61_p6, %p60_p4 }
   0xe   : > { %s40_s30 = ssub.s32 %s722_s21, %s920_s25  ;;  %s197_s6 = sand.u32 1, %s706_s17  }
   0xf   : > { %s44_s5 = sor.u32 %s43_s27, %s40_s30  ;;  %s525_s7 = sshll.u32 %s197_s6, 3 }
  0x10   : > { %p45_p9 = scmp.eq.s32.totalorder %s44_s5, 0  ;;  %s526_s8 = sshll.u32 %s722_s21, 3 }
  0x11   : > { %s209_s10 = sadd.s32 %s718_s20, %s526_s8  ;;  %s201_s12 = scalar_lea.vmem [#allocation3], %s525_s7 }
  0x12   : > { %s826_s9 = scalar_select %p45_p9, %s706_s17, %s47_s26  }
  0x13   : > { %s527_s11 = sshll.u32 %s209_s10, 6  ;;  %s212_s13 = sshll.u32 %s201_s12, 4  ;;  %s213_s13 = int_to_ptr.vmem [resolvable:$true] %s212_s13 }
  0x14   : > { %s211_s23 = scalar_lea.hbm %s897_s0, %s527_s11  ;;  %p836_p10 = pnand %p550_p8, %p810_p5 }
  0x15   : > { %p528_p11 = scmp.ge.s32.totalorder %s726_s22, 1  ;;  %s198_s27 = scalar_lea.sflag [#allocation4], %s197_s6 }
  0x16   : > { %p634_p12 = pneg %p836_p10  ;;  %s645_s26 = scalar_lea.vmem %s213_s13, 128 }
  0x17   : > { %p646_p13 = scmp.ne.s32.totalorder %s213_s13, %s645_s26  ;;  %s728_s30 = smov [#allocation3]  }
  0x18   : > { %s650_s5 = sshll.u32 %s728_s30, 4  ;;  %s651_s5 = int_to_ptr.vmem [resolvable:$false] %s650_s5 }
  0x19   : > { %p648_p0 = pnand %p646_p13, %p634_p12  ;;  %s652_s7 = scalar_lea.vmem %s651_s5, 256 }
  0x1a   : > { %p653_p2 = scmp.lt.s32.totalorder %s213_s13, %s651_s5  ;;  %p654_p3 = scmp.lt.s32.totalorder %s652_s7, %s645_s26 }
  0x1b   : > { %p649_p1 = pneg %p648_p0 }
  0x1c   : > { %p655_p4 = por %p654_p3, %p653_p2 }
  0x1e   : > { %p656_p5 = pnand %p655_p4, %p649_p1 }
  0x20   : > { %659 = shalt.err (!%p656_p5)
}
  0x21   : > { %s729_s28 = smov 256   ;;  %s730_s6 = smov 64  }
  0x22   : > { %s731_s8 = smov 4   ;;  %p232_p6 = scmp.lt.s32.totalorder %s726_s22, 9 }
  0x23   : > { %549 = dma.hbm_to_vmem [thread:$0]  (!%p836_p10), %s211_s23, 128, %s213_s13, %s198_s27, %s729_s28, %s730_s6, %s731_s8  }
  0x24   : > { %p233_p8 = pnand %p528_p11, %p232_p6 }
  0x25   : > { %s238_s10 = sand.u32 (!%p233_p8), 1, %s702_s16  }
  0x26   : > { %236 = sbr.rel (%p233_p8) target bundleno = 404 (0x194), region = 36  ;;  %s529_s11 = sshll.u32 (!%p233_p8), %s238_s10, 3 }
  0x27   : > { %s239_s12 = scalar_lea.sflag (!%p233_p8), [#allocation4], %s238_s10  ;;  %s242_s14 = scalar_lea.vmem (!%p233_p8), [#allocation3], %s529_s11 }
  0x2b   : > { %693 = dma.done.wait (%p816_p7), %s239_s12, 128  }
  0x2c   : > { %695 = vsyncadd (%p816_p7), %s239_s12, 4294967168  ;;  %p280_p9 = scmp.lt.s32.totalorder %s714_s19, 1  ;;  %p531_p7 = scmp.ne.s32.totalorder %s710_s18, 0 }
  0x2e   : > { %s922_s19 = smov (!%p280_p9, %s714_s19), 1  ;;  %300 = sbr.rel (%p531_p7) target bundleno = 53 (0x35), region = 44 }
  0x2f   : > { %s282_s15 = scalar_lea.vmem %s898_s1, %s922_s19  ;;  %s285_s26 = scalar_lea.vmem %s899_s2, %s922_s19 }
  0x30   : > { %s530_s30 = sshll.u32 %s922_s19, 1 }
  0x31   : > { %s864_s28 = scalar_lea.vmem %s901_s4, %s530_s30 }
  0x33   : > { %vm301_vm0 = vcmask 1024   ;;  %v732_v0 = vmov 0.0  }
  0x34   : > { %302 = vst.msk [vmem:[#allocation2] sm:$0x3] %vm301_vm0, %v732_v0 }
  0x35 PF: > { %v541_v1 = vld [vmem:[%s242_s14] sm:$0xff]   ;;  %v532_v2 = vld [vmem:[%s282_s15] ss:$0 sm:$0xff]  ;;  %v733_v5 = vmov 0   ;;  %vm316_vm1 = vcmask 261120   ;;  %v351_v23 = vlaneseq  ;;  %s536_s6 = sshll.u32 %s710_s18, 3 }
  0x36   : > { %v542_v3 = vunpack.c.l.bf16 %v541_v1  ;;  %v543_v4 = vunpack.c.h.bf16 %v541_v1  ;;  %620 = vset.pattern.permute.xlu1 %v733_v5  ;;  %v533_v6 = vld [vmem:[%s285_s26] ss:$0 sm:$0xff]  ;;  %621 = vset.pattern.permute.xlu0 %v733_v5  ;;  %v353_v25 = vstv %s536_s6  ;;  %vm372_vm4 = vcmask 1041409   ;;  %p537_p10 = scmp.ne.s32.totalorder %s710_s18, 3 }
  0x37   : > { %332 = vperm.xlu1 %620, %v533_v6   ;;  %v349_v9 = vld [vmem:[%s900_s3] sm:$0x3]  ;;  %v352_v24 = vand.u32 127, %v351_v23  ;;  %v365_v26 = vshrl.u32 %v351_v23, 7  ;;  %vm376_vm5 = vcmask 58368   ;;  %vm381_vm7 = vcmask 1024  }
  0x38   : > { %v314_v7 = vmul.f32 %v542_v3, %v532_v2  ;;  %v315_v8 = vmul.f32 %v543_v4, %v532_v2 }
  0x39   : > { %v354_v27 = vadd.s32 %v353_v25, %v352_v24  ;;  %v366_v28 = vsub.s32 %v352_v24, %v365_v26 }
  0x3a   : > { %v317_v10 = vsel %vm316_vm1, %v314_v7, 0.0  ;;  %v320_v11 = vsel %vm316_vm1, %v315_v8, 0.0 }
  0x3b   : > { %318 = vadd.xlane.f32.xlu0 %v317_v10  ;;  %356 = vperm.xlu1 %620, %v349_v9   ;;  %vm359_vm2 = vcmp.lt.s32.totalorder %v354_v27, 32  ;;  %v361_v37 = vld [vmem:[#allocation2] sm:$0x3] }
  0x3f   : > { %321 = vadd.xlane.f32.xlu0 %v320_v11 }
  0xb2   : > { %v333_v12 = vpop.permute.xlu1 %332 }
  0xb6   : > { %v357_v29 = vpop.permute.xlu1 %356 }
  0xb7   : > { %vm358_vm3 = vcmp.ge.s32.totalorder %v354_v27, %v357_v29 }
  0xb8   : > { %vm360_vm6 = vmand %vm358_vm3, %vm359_vm2 }
  0xc4   : > { %v319_v13 = vpop.xlane.xlu0 %318 }
  0xc5   : > { %v335_v14 = vadd.f32 %v333_v12, %v319_v13 }
  0xc7   : > { %v534_v15 = vmul.f32 -1.442695, %v335_v14 }
  0xc8   : > { %v322_v16 = vpop.xlane.xlu0 %321 }
  0xc9   : > { %622 = vpow2.f32 %v534_v15  ;;  %v336_v17 = vadd.f32 %v333_v12, %v322_v16 }
  0xcb   : > { %v535_v18 = vmul.f32 -1.442695, %v336_v17 }
  0xcd   : > { %624 = vpow2.f32 %v535_v18 }
  0xd6   : > { %v623_v19 = vpop.eup %622 }
  0xd7   : > { %v343_v20 = vadd.f32 1.0, %v623_v19 }
  0xd9   : > { %626 = vrcp.f32 %v343_v20 }
  0xda   : > { %v625_v21 = vpop.eup %624 }
  0xdb   : > { %v344_v22 = vadd.f32 1.0, %v625_v21 }
  0xdd   : > { %628 = vrcp.f32 %v344_v22 }
  0xe6   : > { %v627_v30 = vpop.eup %626 }
  0xe7   : > { %v367_v32 = vrot.slane %v627_v30, %v366_v28 }
  0xea   : > { %v629_v31 = vpop.eup %628 }
  0xeb   : > { %v371_v33 = vrot.slane %v629_v31, %v366_v28 }
  0xed   : > { %v373_v34 = vsel %vm372_vm4, %v371_v33, %v367_v32 }
  0xee   : > { %v375_v35 = vsel %vm360_vm6, %v373_v34, 0.0 }
  0xef   : > { %v377_v36 = vsel %vm376_vm5, %v375_v35, 0.0 }
  0xf0   : > { %378 = vadd.xlane.f32.xlu0 %v377_v36 }
 0x178   : > { %386 = sbr.rel (%p537_p10) target bundleno = 404 (0x194), region = 48 }
 0x179   : > { %v379_v38 = vpop.xlane.xlu0 %378 }
 0x17a   : > { %v380_v39 = vadd.f32 %v379_v38, %v361_v37 }
 0x17c   : > { %382 = vst.msk [vmem:[#allocation2] sm:$0x3] %vm381_vm7, %v380_v39 }
 0x17d   : > { %v387_v40 = vcvt.s32.f32 %v349_v9 }
 0x17f   : > { %v388_v41 = vsub.f32 32.0, %v387_v40 }
 0x181   : > { %v389_v42 = vmax.f32 %v388_v41, 1.0 }
 0x183   : > { %630 = vrcp.f32 %v389_v42  ;;  %v390_v43 = vld [vmem:[#allocation2] sm:$0x3] }
 0x190   : > { %v631_v44 = vpop.eup %630 }
 0x191   : > { %v392_v45 = vmul.f32 %v631_v44, %v390_v43 }
 0x193   : > { %393 = vst.msk [vmem:[%s864_s28] sm:$0x3] %vm381_vm7, %v392_v45 }
 0x194 PF: > { %s17_s22 = sadd.s32 1, %s726_s22   ;;  %s907_s8 = sld [smem:[#allocation6_spill]] }
 0x195   : > { %p14_p11 = scmp.ge.s32.totalorder %s17_s22, 10   ;;  %s908_s15 = smov %s702_s16 }
 0x196   : > { %s909_s16 = smov %s706_s17  ;;  %s910_s17 = smov %s826_s9 }
 0x197   : > { %s911_s18 = smov %s718_s20  ;;  %s912_s19 = smov %s722_s21 }
 0x198   : > { %s913_s20 = smov %s916_s24  ;;  %16 = sbr.rel (!%p14_p11) target bundleno = 5 (0x5), region = 93 }
 0x19a   : > { %s914_s21 = smov %s907_s8 }
 0x19d   :  { %419 = vsyncpa [#allocation4], 1 }
 0x19e   :  { %421 = vsyncpa [#allocation4 + $0x1], 1 }

</bundles_post_ra>
